<compile_context>
chip_gen: v5e
topology: v5e:2x2
jax: 0.10.0
libtpu: 0.0.40
codegen_flags: <defaults>
</compile_context>

<pallas_src>
import jax
import jax.numpy as jnp
import numpy as np
from jax.experimental import pallas as pl
from jax.experimental.pallas import tpu as pltpu

FP8_MAX = 448.0                  # torch.finfo(torch.float8_e4m3fn).max
FP8_MIN_NORMAL = 2.0 ** -6       # smallest normal fp8 e4m3 magnitude
FP8_SUBNORMAL_STEP = 2.0 ** -9   # fp8 e4m3 subnormal quantum
_SIGNED_MAGIC = 1.5 * 2.0 ** 23  # signed RNE round-to-integer magic for f32
_ABS_MASK = 0x7FFFFFFF
_MIN_NORMAL_BITS = 121 << 23     # f32 bit pattern of 2^-6 (biased exp 121)


def _native_fp8_supported():
    # Native f32<->float8_e4m3fn converts are the cheap path on v6e / v7x.
    # Keep the portable bit-trick on v5e/older/unknown devices.
    try:
        kind = jax.devices()[0].device_kind.lower()
    except Exception:
        return False
    return any(tag in kind for tag in ("v6", "v7", "7x"))


_NATIVE_FP8 = _native_fp8_supported()


def _round_up(a, b):
    return (a + b - 1) // b * b


# --------------------------------------------------------------------------- #
# Kernels: one (block_r, cols) tile -> fake-quantized tile.
# --------------------------------------------------------------------------- #
def _qdq_native_kernel(sc_ref, x_ref, o_ref):
    """Native fp8 e4m3fn round-trip (v6e / v7x): ~5 VALU ops per element."""
    y = x_ref[...].astype(jnp.float32) * sc_ref[1]          # x * (1/scale)
    y = jnp.clip(y, -FP8_MAX, FP8_MAX)
    q = y.astype(jnp.float8_e4m3fn).astype(jnp.float32)     # RNE quantize-dequantize
    o_ref[...] = (q * sc_ref[0]).astype(o_ref.dtype)


def _qdq_bittrick_kernel(sc_ref, x_ref, o_ref):
    """Portable RNE fp8 e4m3fn emulation via f32 bit ops (v5e and older)."""
    y = x_ref[...].astype(jnp.float32) * sc_ref[1]
    y = jnp.clip(y, -FP8_MAX, FP8_MAX)

    # normal range (|y| >= 2^-6): RNE-round f32 mantissa down to 3 bits.
    # +-448 clamp guarantees the round-up never carries into the sign bit.
    bits = pltpu.bitcast(y, jnp.int32)
    lsb = jnp.bitwise_and(jnp.right_shift(bits, 20), 1)
    rbits = jnp.bitwise_and(bits + (0x7FFFF + lsb), jnp.int32(~0xFFFFF))
    q_normal = pltpu.bitcast(rbits, jnp.float32)

    # subnormal range (|y| < 2^-6): quantum 2^-9, RNE via signed magic add.
    t = y * jnp.float32(1.0 / FP8_SUBNORMAL_STEP) + jnp.float32(_SIGNED_MAGIC)
    q_sub = (t - jnp.float32(_SIGNED_MAGIC)) * jnp.float32(FP8_SUBNORMAL_STEP)

    is_sub = jnp.bitwise_and(bits, _ABS_MASK) < _MIN_NORMAL_BITS
    q = jnp.where(is_sub, q_sub, q_normal)
    q = jnp.where(jnp.isnan(y), y, q)   # NaN passthrough (bit rounding would corrupt it)

    o_ref[...] = (q * sc_ref[0]).astype(o_ref.dtype)


# --------------------------------------------------------------------------- #
# Wrapper
# --------------------------------------------------------------------------- #
def _run_2d(x2, scale_arr, native):
    """Fake-quant a 2-D array, streaming row blocks through VMEM."""
    rows, cols = x2.shape
    dtype = x2.dtype
    itemsize = jnp.dtype(dtype).itemsize
    row_align = {4: 8, 2: 16, 1: 32}.get(itemsize, 8)

    # Per-pipeline-buffer VMEM budget (2 in + 2 out buffers => 4x this total):
    #   ~1 MiB on v5e/unknown (16 MiB default scoped VMEM), ~4 MiB on v6e/v7x.
    buf_budget = (4 if native else 1) * 1024 * 1024
    bytes_per_row = _round_up(cols, 128) * itemsize          # VMEM lane padding
    max_rows = max(row_align, (buf_budget // bytes_per_row) // row_align * row_align)
    block_r = min(rows, max_rows)

    # If everything fits in one block, split into two so both v7x TensorCores
    # get work under "parallel" semantics (negligible cost on single-TC chips).
    if rows > row_align and block_r >= rows:
        block_r = min(block_r, _round_up((rows + 1) // 2, row_align))

    grid = (pl.cdiv(rows, block_r),)
    kernel = _qdq_native_kernel if native else _qdq_bittrick_kernel
    flops_per_elem = 5 if native else 18
    cost = pl.CostEstimate(
        flops=flops_per_elem * rows * cols,
        transcendentals=0,
        bytes_accessed=2 * rows * cols * itemsize,
    )

    return pl.pallas_call(
        kernel,
        out_shape=jax.ShapeDtypeStruct((rows, cols), dtype),
        grid=grid,
        in_specs=[
            pl.BlockSpec(memory_space=pltpu.MemorySpace.SMEM),   # [scale, 1/scale]
            pl.BlockSpec((block_r, cols), lambda i: (i, 0)),     # x tile
        ],
        out_specs=pl.BlockSpec((block_r, cols), lambda i: (i, 0)),
        compiler_params=pltpu.CompilerParams(dimension_semantics=("parallel",)),
        cost_estimate=cost,
    )(scale_arr, x2)


@jax.jit
def quant_module_forward(x, scale):
    """JAX/Pallas equivalent of QuantModule.forward(x) == quant.quant_fn(x, scale)."""
    orig_shape = x.shape
    dtype = x.dtype
    n = x.size
    if n == 0:
        return x

    scale_f = jnp.asarray(scale, jnp.float32).reshape(())
    inv_scale_f = jnp.float32(1.0) / scale_f
    scale_arr = jnp.stack([scale_f, inv_scale_f])            # -> SMEM
    native = _NATIVE_FP8

    if n % 128 == 0:
        # Common case: lane-dense (rows, 128) view; contiguous reshape is free.
        out2 = _run_2d(x.reshape(n // 128, 128), scale_arr, native)
        return out2.reshape(orig_shape)

    # Ragged total size: keep the original trailing dim as the lane axis so the
    # whole tensor still goes through ONE pallas_call (no pad / concat / slice).
    cols = orig_shape[-1] if len(orig_shape) >= 1 else 1
    rows = n // cols
    itemsize = jnp.dtype(dtype).itemsize
    row_align = {4: 8, 2: 16, 1: 32}.get(itemsize, 8)
    if row_align * _round_up(cols, 128) * itemsize <= 4 * 1024 * 1024:
        out2 = _run_2d(x.reshape(rows, cols), scale_arr, native)
        return out2.reshape(orig_shape)

    # TODO(synk): pathological case (huge non-128-divisible trailing dim); pad the
    # flat view to a 128 multiple (one extra copy) rather than tiling a ragged lane.
    pad = (-n) % 128
    flat = jnp.pad(x.reshape(-1), (0, pad))
    out2 = _run_2d(flat.reshape(-1, 128), scale_arr, native)
    return out2.reshape(-1)[:n].reshape(orig_shape)


if __name__ == "__main__":
    # QuantModule.__init__(scale): scalar scale buffer, deterministic value.
    scale = 0.05

    # Main test: 128-divisible numel -> optimal (rows, 128) path.
    x = jax.random.normal(jax.random.PRNGKey(0), (2, 4, 16, 16), dtype=jnp.float32) * 3.0
    out = jax.block_until_ready(quant_module_forward(x, scale))
    ref = (
        jnp.clip(x / jnp.float32(scale), -FP8_MAX, FP8_MAX)
        .astype(jnp.float8_e4m3fn)
        .astype(jnp.float32)
        * jnp.float32(scale)
    )
    np.testing.assert_allclose(
        np.asarray(out), np.asarray(ref),
        rtol=0.13, atol=scale * FP8_SUBNORMAL_STEP + 1e-8,
    )

    # Ragged test: numel not a multiple of 128 -> trailing-dim lane path
    # (single pallas_call, no pad / concat).
    x2 = jax.random.normal(jax.random.PRNGKey(1), (3, 1000), dtype=jnp.float32) * 2.0
    out2 = jax.block_until_ready(quant_module_forward(x2, scale))
    ref2 = (
        jnp.clip(x2 / jnp.float32(scale), -FP8_MAX, FP8_MAX)
        .astype(jnp.float8_e4m3fn)
        .astype(jnp.float32)
        * jnp.float32(scale)
    )
    np.testing.assert_allclose(
        np.asarray(out2), np.asarray(ref2),
        rtol=0.13, atol=scale * FP8_SUBNORMAL_STEP + 1e-8,
    )

    print("KERNEL_OK")
</pallas_src>

<mosaic_0001>
module attributes {stable_mosaic.version = 11 : i64} {
  func.func @_qdq_bittrick_kernel(%arg0: i32, %arg1: memref<2xf32, #tpu.memory_space<smem>>, %arg2: memref<8x128xf32, #tpu.memory_space<vmem>>, %arg3: memref<8x128xf32, #tpu.memory_space<vmem>>) attributes {dimension_semantics = [#tpu.dimension_semantics<parallel>], iteration_bounds = array<i64: 2>, scalar_prefetch = 0 : i64, scratch_operands = 0 : i64, tpu.core_type = #tpu.core_type<tc>, window_params = [{transform_indices = @transform_0, window_bounds = array<i64: 2>}, {transform_indices = @transform_1, window_bounds = array<i64: 8, 128>}, {transform_indices = @transform_2, window_bounds = array<i64: 8, 128>}]} {
    %c0 = arith.constant 0 : index
    %c0_0 = arith.constant 0 : index
    %0 = vector.load %arg2[%c0, %c0_0] : memref<8x128xf32, #tpu.memory_space<vmem>>, vector<8x128xf32>
    %c1 = arith.constant 1 : index
    %1 = memref.load %arg1[%c1] : memref<2xf32, #tpu.memory_space<smem>>
    %2 = vector.broadcast %1 : f32 to vector<8x128xf32>
    %3 = arith.mulf %0, %2 : vector<8x128xf32>
    %cst = arith.constant -4.480000e+02 : f32
    %cst_1 = arith.constant 4.480000e+02 : f32
    %4 = vector.broadcast %cst : f32 to vector<8x128xf32>
    %5 = arith.maximumf %4, %3 : vector<8x128xf32>
    %6 = vector.broadcast %cst_1 : f32 to vector<8x128xf32>
    %7 = arith.minimumf %6, %5 : vector<8x128xf32>
    %8 = tpu.bitcast %7 : vector<8x128xf32> -> vector<8x128xi32>
    %c20_i32 = arith.constant 20 : i32
    %9 = vector.broadcast %c20_i32 : i32 to vector<8x128xi32>
    %10 = arith.shrsi %8, %9 : vector<8x128xi32>
    %c1_i32 = arith.constant 1 : i32
    %11 = vector.broadcast %c1_i32 : i32 to vector<8x128xi32>
    %12 = arith.andi %10, %11 : vector<8x128xi32>
    %c524287_i32 = arith.constant 524287 : i32
    %13 = vector.broadcast %c524287_i32 : i32 to vector<8x128xi32>
    %14 = arith.addi %13, %12 : vector<8x128xi32>
    %15 = arith.addi %8, %14 : vector<8x128xi32>
    %c-1048576_i32 = arith.constant -1048576 : i32
    %16 = vector.broadcast %c-1048576_i32 : i32 to vector<8x128xi32>
    %17 = arith.andi %15, %16 : vector<8x128xi32>
    %18 = tpu.bitcast %17 : vector<8x128xi32> -> vector<8x128xf32>
    %cst_2 = arith.constant 5.120000e+02 : f32
    %19 = vector.broadcast %cst_2 : f32 to vector<8x128xf32>
    %20 = arith.mulf %7, %19 : vector<8x128xf32>
    %cst_3 = arith.constant 0x4B400000 : f32
    %21 = vector.broadcast %cst_3 : f32 to vector<8x128xf32>
    %22 = arith.addf %20, %21 : vector<8x128xf32>
    %cst_4 = arith.constant 0x4B400000 : f32
    %23 = vector.broadcast %cst_4 : f32 to vector<8x128xf32>
    %24 = arith.subf %22, %23 : vector<8x128xf32>
    %cst_5 = arith.constant 0.001953125 : f32
    %25 = vector.broadcast %cst_5 : f32 to vector<8x128xf32>
    %26 = arith.mulf %24, %25 : vector<8x128xf32>
    %c2147483647_i32 = arith.constant 2147483647 : i32
    %27 = vector.broadcast %c2147483647_i32 : i32 to vector<8x128xi32>
    %28 = arith.andi %8, %27 : vector<8x128xi32>
    %c1015021568_i32 = arith.constant 1015021568 : i32
    %29 = vector.broadcast %c1015021568_i32 : i32 to vector<8x128xi32>
    %30 = arith.cmpi slt, %28, %29 : vector<8x128xi32>
    %31 = arith.select %30, %26, %18 : vector<8x128xi1>, vector<8x128xf32>
    %32 = arith.cmpf one, %7, %7 : vector<8x128xf32>
    %33 = arith.select %32, %7, %31 : vector<8x128xi1>, vector<8x128xf32>
    %c0_6 = arith.constant 0 : index
    %34 = memref.load %arg1[%c0_6] : memref<2xf32, #tpu.memory_space<smem>>
    %35 = vector.broadcast %34 : f32 to vector<8x128xf32>
    %36 = arith.mulf %33, %35 : vector<8x128xf32>
    %c0_7 = arith.constant 0 : index
    %c0_8 = arith.constant 0 : index
    %37 = vector.load %arg3[%c0_7, %c0_8] : memref<8x128xf32, #tpu.memory_space<vmem>>, vector<8x128xf32>
    tpu.vector_store %arg3[%c0_7, %c0_8], %36 {strides = array<i32>} : memref<8x128xf32, #tpu.memory_space<vmem>>, vector<8x128xf32>,
    return
  }
  func.func @transform_0(%arg0: i32) -> i32 {
    %c0_i32 = arith.constant 0 : i32
    %c0_i32_0 = arith.constant 0 : i32
    return %c0_i32 : i32
  }
  func.func @transform_1(%arg0: i32) -> (i32, i32) {
    %c0_i32 = arith.constant 0 : i32
    %c0_i32_0 = arith.constant 0 : i32
    return %arg0, %c0_i32 : i32, i32
  }
  func.func @transform_2(%arg0: i32) -> (i32, i32) {
    %c0_i32 = arith.constant 0 : i32
    %c0_i32_0 = arith.constant 0 : i32
    return %arg0, %c0_i32 : i32, i32
  }
}

</mosaic_0001>

<bundles_post_ra>
// kernel: quant_module_forward.1
= control target key start
LH: loop header
LB: loop body
LE: loop exit
PB: predicated region body
PF: predicated region fallthrough
CT: control target
= control target key end

     0   :  { %7 = vsyncpa [#allocation3], 0  ;;  %s320_s9 = smov 0   ;;  %s340_s0 = inlined_call_operand.vmem [shape: f32[2], index: 0, kind: input, shape index: {}]   ;;  %s341_s1 = inlined_call_operand.vmem [shape: f32[16,128], index: 1, kind: input, shape index: {}]   ;;  %s342_s2 = inlined_call_operand.vmem [shape: f32[16,128], index: 2, kind: output, shape index: {}]  }
   0x1 LB: > { %s244_s10 = sadd.s32 4294967295, %s302_s9   ;;  %p246_p0 = scmp.ge.s32.totalorder %s302_s9, 1  ;;  %s302_s9 = sphi %s320_s9, %s13_s9  }
   0x2   : > { %p91_p1 = scmp.lt.s32.totalorder %s302_s9, 3  ;;  %s103_s13 = sshll.u32 %s340_s0, 4  ;;  %s104_s13 = int_to_ptr.vmem [resolvable:$true] %s103_s13 }
   0x3   : > { %p266_p3 = scmp.eq.s32.totalorder %s244_s10, 0  ;;  %s304_s14 = smov [#allocation2]  }
   0x4   : > { %p92_p2 = pnand %p246_p0, %p91_p1 }
   0x6   : > { %p262_p4 = pneg %p92_p2  ;;  %123 = sbr.rel (%p92_p2) target bundleno = 40 (0x28), region = 28 }
   0x8   : > { %p263_p5 = pnand %p266_p3, %p262_p4 }
   0xa   : > { %265 = dma.vmem_to_smem (!%p263_p5), %s104_s13, 16, %s304_s14, [#allocation3]  }
   0xb   : > { %297 = dma.done.wait (%p266_p3), [#allocation3], 16  }
   0xc   : > { %299 = vsyncadd (%p266_p3), [#allocation3], 4294967280 }
   0xd   : > { %130 = sfence }
   0xe   : > { %p145_p6 = scmp.lt.s32.totalorder %s244_s10, 1  ;;  %s253_s15 = sld [smem:[#allocation2 + $0x1]] }
   0xf   : > { %s175_s20 = sld [smem:[#allocation2]] }
  0x10   : > { %s344_s10 = smov (!%p145_p6, %s244_s10), 1 }
  0x11   : > { %s251_s16 = sshll.u32 %s344_s10, 3 }
  0x12   : > { %s148_s19 = scalar_lea.vmem %s341_s1, %s251_s16  ;;  %s152_s23 = scalar_lea.vmem %s342_s2, %s251_s16 }
  0x13   : > { %v153_v0 = vld [vmem:[%s148_s19] sm:$0xff] }
  0x14   : > { %v155_v1 = vstv %s253_s15 }
  0x15   : > { %v156_v2 = vmul.f32 %v155_v1, %v153_v0  ;;  %v176_v14 = vstv %s175_s20 }
  0x17   : > { %v254_v3 = vclamps-f32 %v156_v2, 448.0 }
  0x19   : > { %v160_v4 = vshra.s32 %v254_v3, 20  ;;  %v166_v5 = vmul.f32 512.0, %v254_v3  ;;  %v170_v8 = vand.u32 2147483647, %v254_v3  ;;  %vm173_vm1 = vcmp.ne.f32.partialorder %v254_v3, %v254_v3 }
  0x1b   : > { %v161_v6 = vand.u32 1, %v160_v4  ;;  %v167_v7 = vadd.f32 12582912.0, %v166_v5  ;;  %vm171_vm0 = vcmp.lt.s32.totalorder %v170_v8, 1015021568 }
  0x1d   : > { %v162_v9 = vadd.s32 524287, %v161_v6  ;;  %v255_v10 = vadd.f32 -12582912.0, %v167_v7 }
  0x1f   : > { %v163_v11 = vadd.s32 %v254_v3, %v162_v9  ;;  %v169_v12 = vmul.f32 0.001953125, %v255_v10 }
  0x21   : > { %v164_v13 = vand.u32 4293918720, %v163_v11 }
  0x23   : > { %v172_v15 = vsel %vm171_vm0, %v169_v12, %v164_v13 }
  0x24   : > { %v174_v16 = vsel %vm173_vm1, %v254_v3, %v172_v15 }
  0x25   : > { %v177_v17 = vmul.f32 %v176_v14, %v174_v16 }
  0x27   : > { %178 = vst [vmem:[%s152_s23] sm:$0xff] %v177_v17 }
  0x28 PF: > { %s13_s9 = sadd.s32 1, %s302_s9  }
  0x29   : > { %p10_p7 = scmp.ge.s32.totalorder %s13_s9, 4  }
  0x2b   :  { %12 = sbr.rel (!%p10_p7) target bundleno = 1 (0x1), region = 63 }
  0x30   :  { %198 = vsyncpa [#allocation3], 1 }
  0x31   :  { %200 = vsyncpa [#allocation3 + $0x1], 1 }

</bundles_post_ra>
